<compile_context>
chip_gen: v6e
topology: v6e:2x2x1
jax: 0.10.0
libtpu: 0.0.40
codegen_flags: <defaults>
</compile_context>

<pallas_src>
import math

import jax
import jax.numpy as jnp
from jax.experimental import pallas as pl
from jax.experimental.pallas import tpu as pltpu

_MIB = 1024 * 1024


def _round_up(x: int, m: int) -> int:
    return ((x + m - 1) // m) * m


# ----------------------------------------------------------------------------- kernel
def _idm_kernel(state_ref, next_state_ref,
                ws_ref, bs_ref,
                wns_ref, bns_ref,
                wh1_ref, wh2_ref, bh_ref,
                out_ref):
    # MXU operand dtype follows the prepared weights (f32 or bf16);
    # accumulation and the whole elementwise epilogue stay in f32.
    cdt = ws_ref.dtype
    x_s = state_ref[...].astype(cdt)
    x_n = next_state_ref[...].astype(cdt)

    # Hidden branch for `state`
    s = jnp.dot(x_s, ws_ref[...], preferred_element_type=jnp.float32)
    s = jnp.maximum(s + bs_ref[...], 0.0)

    # Hidden branch for `next_state`
    ns = jnp.dot(x_n, wns_ref[...], preferred_element_type=jnp.float32)
    ns = jnp.maximum(ns + bns_ref[...], 0.0)

    # Head: concat fused as two matmuls against the split head weight (exact).
    logits = (jnp.dot(s.astype(cdt), wh1_ref[...], preferred_element_type=jnp.float32)
              + jnp.dot(ns.astype(cdt), wh2_ref[...], preferred_element_type=jnp.float32)
              + bh_ref[...])
    out_ref[...] = jnp.tanh(logits).astype(out_ref.dtype)


# ----------------------------------------------------------------------------- weight prep (call ONCE)
def prepare_params(params, *, compute_dtype=jnp.float32):
    """One-time layout prep: transpose weights to (in, out), split the head
    weight for the fused concat, reshape biases to (1, F).  Biases stay f32 so
    the epilogue math is f32 on every TPU generation."""
    H = params["w_state"].shape[0]
    A = params["w_head"].shape[0]
    cdt = compute_dtype
    return {
        "ws":  jnp.asarray(params["w_state"].T, cdt),        # (S, H)
        "wns": jnp.asarray(params["w_next"].T, cdt),         # (S, H)
        "wh1": jnp.asarray(params["w_head"][:, :H].T, cdt),  # (H, A)
        "wh2": jnp.asarray(params["w_head"][:, H:].T, cdt),  # (H, A)
        "bs":  jnp.asarray(params["b_state"], jnp.float32).reshape(1, H),
        "bns": jnp.asarray(params["b_next"], jnp.float32).reshape(1, H),
        "bh":  jnp.asarray(params["b_head"], jnp.float32).reshape(1, A),
    }


# ----------------------------------------------------------------------------- sizing helpers
def _pad_tile(rows: int, cols: int, itemsize: int) -> int:
    """Physical VMEM footprint of a (rows, cols) buffer: rows pad to the dtype
    sublane multiple (8 f32, 16 bf16, 32 int8), cols pad to 128 lanes."""
    sub = max(8, 32 // itemsize)
    return _round_up(max(rows, 1), sub) * _round_up(max(cols, 1), 128) * itemsize


def _vmem_bytes(block_b, S, H, A, in_dt, w_dt):
    """(8,128)-padded working set for one grid step."""
    in_b, w_b = in_dt.itemsize, w_dt.itemsize
    inputs = 2 * 2 * _pad_tile(block_b, S, in_b)      # state + next_state, double-buffered
    outputs = 2 * _pad_tile(block_b, A, 4)            # f32 output tile, double-buffered
    weights = (2 * _pad_tile(S, H, w_b)               # ws, wns   (single-buffered)
               + 2 * _pad_tile(H, A, w_b)             # wh1, wh2  (single-buffered)
               + 2 * _pad_tile(1, H, 4) + _pad_tile(1, A, 4))   # biases
    return inputs + outputs + weights


def _tpu_vmem_capacity() -> int:
    """Per-core VMEM capacity; conservative 64 MiB (v7x per-TC) fallback."""
    try:
        cap = int(pltpu.get_tpu_info().vmem_capacity_bytes)
        if 16 * _MIB <= cap <= 256 * _MIB:
            return cap
    except Exception:
        pass
    return 64 * _MIB


def _tile_targets(vmem_cap: int):
    """(input bytes per grid step, double-buffered working-set cap)."""
    if vmem_cap <= 64 * _MIB:
        # v7x: ~3.2 TB/s per TC, so the ~0.35us per-step overhead needs more
        # bytes to amortize; but only 64 MiB VMEM per TC -> tighter cap.
        return 8 * _MIB, 40 * _MIB
    # v5e / v6e: ~0.8-1.4 TB/s HBM, 128 MiB physical VMEM.
    return 4 * _MIB, 48 * _MIB


def _choose_block_b(B, S, H, A, in_dt, w_dt, requested, step_target, vmem_target):
    row_mult = max(8, 32 // in_dt.itemsize)           # 8 f32, 16 bf16
    if requested is None:
        bytes_per_row = 2 * S * in_dt.itemsize        # state + next_state
        bb = _round_up(max(1, step_target // max(1, bytes_per_row)), row_mult)
        if B >= 2 * row_mult:
            # Guarantee >= 2 grid steps so v7x's two TensorCores (each with its
            # own HBM path) both get work; harmless on single-TC v5e/v6e.
            bb = min(bb, _round_up(pl.cdiv(B, 2), row_mult))
    else:
        bb = _round_up(max(1, int(requested)), row_mult)
    # Shrink until the padded, double-buffered working set fits the VMEM budget.
    while bb > row_mult and _vmem_bytes(bb, S, H, A, in_dt, w_dt) > vmem_target:
        bb = _round_up(max(row_mult, bb // 2), row_mult)
    # Layout-legal block: either a multiple of row_mult strictly below B
    # (partial last block is masked by Pallas), or the full batch dim.
    if bb >= B:
        bb = B
    return bb


# ----------------------------------------------------------------------------- wrapper
def inverse_dynamic_model(state, next_state, prepped, *, block_b=None):
    """Fused forward pass.  `prepped` comes from prepare_params() (done once).
    `state`/`next_state` may be f32 or bf16 (bf16 halves the dominant HBM stream)."""
    assert state.shape == next_state.shape
    B, S = state.shape
    H = prepped["ws"].shape[1]
    A = prepped["bh"].shape[1]
    in_dt = jnp.dtype(state.dtype)
    w_dt = jnp.dtype(prepped["ws"].dtype)

    vmem_cap = _tpu_vmem_capacity()
    step_target, vmem_target = _tile_targets(vmem_cap)
    bb = _choose_block_b(B, S, H, A, in_dt, w_dt, block_b, step_target, vmem_target)
    grid = (pl.cdiv(B, bb),)          # ragged tail handled by Pallas edge masking

    ws_bytes = _vmem_bytes(bb, S, H, A, in_dt, w_dt)
    vmem_limit = int(min(vmem_cap - 8 * _MIB,
                         max(16 * _MIB, ws_bytes + max(2 * _MIB, ws_bytes // 4))))

    batch_spec = pl.BlockSpec((bb, S), lambda i: (i, 0))
    out_spec = pl.BlockSpec((bb, A), lambda i: (i, 0))

    def resident(arr):
        # Grid-invariant weights/biases: fetched once; single pipeline buffer
        # (double-buffering an operand whose index map never changes is waste).
        return pl.BlockSpec(arr.shape, lambda i: (0, 0),
                            pipeline_mode=pl.Buffered(1))

    return pl.pallas_call(
        _idm_kernel,
        out_shape=jax.ShapeDtypeStruct((B, A), jnp.float32),
        grid_spec=pltpu.PrefetchScalarGridSpec(
            num_scalar_prefetch=0,
            grid=grid,
            in_specs=[
                batch_spec,                                       # state tile
                batch_spec,                                       # next_state tile
                resident(prepped["ws"]), resident(prepped["bs"]),   # W_state^T, b_state
                resident(prepped["wns"]), resident(prepped["bns"]), # W_next^T,  b_next
                resident(prepped["wh1"]), resident(prepped["wh2"]), # head split
                resident(prepped["bh"]),                            # b_head
            ],
            out_specs=out_spec,
        ),
        compiler_params=pltpu.CompilerParams(
            dimension_semantics=("parallel",),
            vmem_limit_bytes=vmem_limit),
    )(state, next_state,
      prepped["ws"], prepped["bs"],
      prepped["wns"], prepped["bns"],
      prepped["wh1"], prepped["wh2"], prepped["bh"])


# ----------------------------------------------------------------------------- init + reference
def _xavier_uniform(key, out_f, in_f):
    # Matches torch.nn.init.xavier_uniform_ (gain=1) for a (out, in) weight.
    bound = math.sqrt(6.0 / (in_f + out_f))
    return jax.random.uniform(key, (out_f, in_f), jnp.float32, -bound, bound)


def init_params(key, state_size, action_size, hidden_size):
    k1, k2, k3 = jax.random.split(key, 3)
    return {
        "w_state": _xavier_uniform(k1, hidden_size, state_size),
        "b_state": jnp.zeros((hidden_size,), jnp.float32),
        "w_next": _xavier_uniform(k2, hidden_size, state_size),
        "b_next": jnp.zeros((hidden_size,), jnp.float32),
        "w_head": _xavier_uniform(k3, action_size, 2 * hidden_size),
        "b_head": jnp.zeros((action_size,), jnp.float32),
    }


def _reference(state, next_state, p):
    s = jax.nn.relu(state @ p["w_state"].T + p["b_state"])
    ns = jax.nn.relu(next_state @ p["w_next"].T + p["b_next"])
    return jnp.tanh(jnp.concatenate([s, ns], axis=1) @ p["w_head"].T + p["b_head"])


# ----------------------------------------------------------------------------- demo / check
if __name__ == "__main__":
    batch, state_size, action_size, hidden_size = 200, 16, 4, 32

    key = jax.random.PRNGKey(0)
    kp, ks, kn = jax.random.split(key, 3)
    params = init_params(kp, state_size, action_size, hidden_size)
    state = jax.random.normal(ks, (batch, state_size), jnp.float32)
    next_state = jax.random.normal(kn, (batch, state_size), jnp.float32)

    ref = _reference(state, next_state, params)

    # Weight prep hoisted out of the per-step call path: done once, reused.
    prepped_f32 = prepare_params(params)                                  # exact path
    prepped_bf16 = prepare_params(params, compute_dtype=jnp.bfloat16)     # bf16 MXU path

    run = jax.jit(inverse_dynamic_model, static_argnames=("block_b",))

    # 1) Heuristic tile: >=2 grid steps (v7x 2-TC split), ragged tail masked (no pad).
    out = jax.block_until_ready(run(state, next_state, prepped_f32))
    assert out.shape == (batch, action_size)
    assert jnp.allclose(out, ref, atol=1e-5, rtol=1e-5), "f32 default-tile mismatch"

    # 2) Explicit 64-row tiles -> grid (4,) with a masked 56-row overhang in the last block.
    out_tiled = jax.block_until_ready(run(state, next_state, prepped_f32, block_b=64))
    assert jnp.allclose(out_tiled, ref, atol=1e-5, rtol=1e-5), "f32 tiled mismatch"

    # 3) bf16 activations in HBM + bf16 MXU operands; f32 accumulate / epilogue
    #    (halves the dominant input byte stream; loose tolerance by design).
    state_bf16 = state.astype(jnp.bfloat16)
    next_state_bf16 = next_state.astype(jnp.bfloat16)
    out_bf16 = jax.block_until_ready(
        run(state_bf16, next_state_bf16, prepped_bf16, block_b=64))
    assert out_bf16.shape == (batch, action_size)
    assert jnp.allclose(out_bf16, ref, atol=1e-1), "bf16 path diverged"

    # TODO(synk): the PyTorch `return_stats=True` variant just returns (x, {}) — trivially
    # handled by the caller, not part of the kernel.
    print("KERNEL_OK")
</pallas_src>

<mosaic_0001>
module attributes {stable_mosaic.version = 11 : i64} {
  func.func @_idm_kernel(%arg0: i32, %arg1: memref<104x16xf32, #tpu.memory_space<vmem>>, %arg2: memref<104x16xf32, #tpu.memory_space<vmem>>, %arg3: memref<16x32xf32, #tpu.memory_space<vmem>>, %arg4: memref<1x32xf32, #tpu.memory_space<vmem>>, %arg5: memref<16x32xf32, #tpu.memory_space<vmem>>, %arg6: memref<1x32xf32, #tpu.memory_space<vmem>>, %arg7: memref<32x4xf32, #tpu.memory_space<vmem>>, %arg8: memref<32x4xf32, #tpu.memory_space<vmem>>, %arg9: memref<1x4xf32, #tpu.memory_space<vmem>>, %arg10: memref<104x4xf32, #tpu.memory_space<vmem>>) attributes {dimension_semantics = [#tpu.dimension_semantics<parallel>], iteration_bounds = array<i64: 2>, scalar_prefetch = 0 : i64, scratch_operands = 0 : i64, tpu.core_type = #tpu.core_type<tc>, window_params = [{transform_indices = @transform_0, window_bounds = array<i64: 104, 16>}, {transform_indices = @transform_1, window_bounds = array<i64: 104, 16>}, {pipeline_mode = #tpu.pipeline_mode<synchronous>, transform_indices = @transform_2, window_bounds = array<i64: 16, 32>}, {pipeline_mode = #tpu.pipeline_mode<synchronous>, transform_indices = @transform_3, window_bounds = array<i64: 1, 32>}, {pipeline_mode = #tpu.pipeline_mode<synchronous>, transform_indices = @transform_4, window_bounds = array<i64: 16, 32>}, {pipeline_mode = #tpu.pipeline_mode<synchronous>, transform_indices = @transform_5, window_bounds = array<i64: 1, 32>}, {pipeline_mode = #tpu.pipeline_mode<synchronous>, transform_indices = @transform_6, window_bounds = array<i64: 32, 4>}, {pipeline_mode = #tpu.pipeline_mode<synchronous>, transform_indices = @transform_7, window_bounds = array<i64: 32, 4>}, {pipeline_mode = #tpu.pipeline_mode<synchronous>, transform_indices = @transform_8, window_bounds = array<i64: 1, 4>}, {transform_indices = @transform_9, window_bounds = array<i64: 104, 4>}]} {
    %c0 = arith.constant 0 : index
    %c0_0 = arith.constant 0 : index
    %0 = vector.load %arg1[%c0, %c0_0] : memref<104x16xf32, #tpu.memory_space<vmem>>, vector<104x16xf32>
    %c0_1 = arith.constant 0 : index
    %c0_2 = arith.constant 0 : index
    %1 = vector.load %arg2[%c0_1, %c0_2] : memref<104x16xf32, #tpu.memory_space<vmem>>, vector<104x16xf32>
    %c0_3 = arith.constant 0 : index
    %c0_4 = arith.constant 0 : index
    %2 = vector.load %arg3[%c0_3, %c0_4] : memref<16x32xf32, #tpu.memory_space<vmem>>, vector<16x32xf32>
    %cst = arith.constant dense<0.000000e+00> : vector<104x32xf32>
    %3 = tpu.matmul %0, %2, %cst {dimension_numbers = #tpu.dot_dimension_numbers<[1], [0], [0], [1], [0, 0, 1, 1], [], []>} : vector<104x16xf32>, vector<16x32xf32>, vector<104x32xf32> -> vector<104x32xf32>
    %c0_5 = arith.constant 0 : index
    %c0_6 = arith.constant 0 : index
    %4 = vector.load %arg4[%c0_5, %c0_6] : memref<1x32xf32, #tpu.memory_space<vmem>>, vector<1x32xf32>
    %5 = vector.broadcast %4 : vector<1x32xf32> to vector<104x32xf32>
    %6 = arith.addf %3, %5 : vector<104x32xf32>
    %cst_7 = arith.constant 0.000000e+00 : f32
    %7 = vector.broadcast %cst_7 : f32 to vector<104x32xf32>
    %8 = arith.maximumf %6, %7 : vector<104x32xf32>
    %c0_8 = arith.constant 0 : index
    %c0_9 = arith.constant 0 : index
    %9 = vector.load %arg5[%c0_8, %c0_9] : memref<16x32xf32, #tpu.memory_space<vmem>>, vector<16x32xf32>
    %cst_10 = arith.constant dense<0.000000e+00> : vector<104x32xf32>
    %10 = tpu.matmul %1, %9, %cst_10 {dimension_numbers = #tpu.dot_dimension_numbers<[1], [0], [0], [1], [0, 0, 1, 1], [], []>} : vector<104x16xf32>, vector<16x32xf32>, vector<104x32xf32> -> vector<104x32xf32>
    %c0_11 = arith.constant 0 : index
    %c0_12 = arith.constant 0 : index
    %11 = vector.load %arg6[%c0_11, %c0_12] : memref<1x32xf32, #tpu.memory_space<vmem>>, vector<1x32xf32>
    %12 = vector.broadcast %11 : vector<1x32xf32> to vector<104x32xf32>
    %13 = arith.addf %10, %12 : vector<104x32xf32>
    %cst_13 = arith.constant 0.000000e+00 : f32
    %14 = vector.broadcast %cst_13 : f32 to vector<104x32xf32>
    %15 = arith.maximumf %13, %14 : vector<104x32xf32>
    %c0_14 = arith.constant 0 : index
    %c0_15 = arith.constant 0 : index
    %16 = vector.load %arg7[%c0_14, %c0_15] : memref<32x4xf32, #tpu.memory_space<vmem>>, vector<32x4xf32>
    %cst_16 = arith.constant dense<0.000000e+00> : vector<104x4xf32>
    %17 = tpu.matmul %8, %16, %cst_16 {dimension_numbers = #tpu.dot_dimension_numbers<[1], [0], [0], [1], [0, 0, 1, 1], [], []>} : vector<104x32xf32>, vector<32x4xf32>, vector<104x4xf32> -> vector<104x4xf32>
    %c0_17 = arith.constant 0 : index
    %c0_18 = arith.constant 0 : index
    %18 = vector.load %arg8[%c0_17, %c0_18] : memref<32x4xf32, #tpu.memory_space<vmem>>, vector<32x4xf32>
    %cst_19 = arith.constant dense<0.000000e+00> : vector<104x4xf32>
    %19 = tpu.matmul %15, %18, %cst_19 {dimension_numbers = #tpu.dot_dimension_numbers<[1], [0], [0], [1], [0, 0, 1, 1], [], []>} : vector<104x32xf32>, vector<32x4xf32>, vector<104x4xf32> -> vector<104x4xf32>
    %20 = arith.addf %17, %19 : vector<104x4xf32>
    %c0_20 = arith.constant 0 : index
    %c0_21 = arith.constant 0 : index
    %21 = vector.load %arg9[%c0_20, %c0_21] : memref<1x4xf32, #tpu.memory_space<vmem>>, vector<1x4xf32>
    %22 = vector.broadcast %21 : vector<1x4xf32> to vector<104x4xf32>
    %23 = arith.addf %20, %22 : vector<104x4xf32>
    %24 = math.tanh %23 : vector<104x4xf32>
    %c0_22 = arith.constant 0 : index
    %c0_23 = arith.constant 0 : index
    %25 = vector.load %arg10[%c0_22, %c0_23] : memref<104x4xf32, #tpu.memory_space<vmem>>, vector<104x4xf32>
    tpu.vector_store %arg10[%c0_22, %c0_23], %24 {strides = array<i32>} : memref<104x4xf32, #tpu.memory_space<vmem>>, vector<104x4xf32>,
    return
  }
  func.func @transform_0(%arg0: i32) -> (i32, i32) {
    %c0_i32 = arith.constant 0 : i32
    %c0_i32_0 = arith.constant 0 : i32
    return %arg0, %c0_i32 : i32, i32
  }
  func.func @transform_1(%arg0: i32) -> (i32, i32) {
    %c0_i32 = arith.constant 0 : i32
    %c0_i32_0 = arith.constant 0 : i32
    return %arg0, %c0_i32 : i32, i32
  }
  func.func @transform_2(%arg0: i32) -> (i32, i32) {
    %c0_i32 = arith.constant 0 : i32
    %c0_i32_0 = arith.constant 0 : i32
    %c0_i32_1 = arith.constant 0 : i32
    return %c0_i32, %c0_i32_0 : i32, i32
  }
  func.func @transform_3(%arg0: i32) -> (i32, i32) {
    %c0_i32 = arith.constant 0 : i32
    %c0_i32_0 = arith.constant 0 : i32
    %c0_i32_1 = arith.constant 0 : i32
    return %c0_i32, %c0_i32_0 : i32, i32
  }
  func.func @transform_4(%arg0: i32) -> (i32, i32) {
    %c0_i32 = arith.constant 0 : i32
    %c0_i32_0 = arith.constant 0 : i32
    %c0_i32_1 = arith.constant 0 : i32
    return %c0_i32, %c0_i32_0 : i32, i32
  }
  func.func @transform_5(%arg0: i32) -> (i32, i32) {
    %c0_i32 = arith.constant 0 : i32
    %c0_i32_0 = arith.constant 0 : i32
    %c0_i32_1 = arith.constant 0 : i32
    return %c0_i32, %c0_i32_0 : i32, i32
  }
  func.func @transform_6(%arg0: i32) -> (i32, i32) {
    %c0_i32 = arith.constant 0 : i32
    %c0_i32_0 = arith.constant 0 : i32
    %c0_i32_1 = arith.constant 0 : i32
    return %c0_i32, %c0_i32_0 : i32, i32
  }
  func.func @transform_7(%arg0: i32) -> (i32, i32) {
    %c0_i32 = arith.constant 0 : i32
    %c0_i32_0 = arith.constant 0 : i32
    %c0_i32_1 = arith.constant 0 : i32
    return %c0_i32, %c0_i32_0 : i32, i32
  }
  func.func @transform_8(%arg0: i32) -> (i32, i32) {
    %c0_i32 = arith.constant 0 : i32
    %c0_i32_0 = arith.constant 0 : i32
    %c0_i32_1 = arith.constant 0 : i32
    return %c0_i32, %c0_i32_0 : i32, i32
  }
  func.func @transform_9(%arg0: i32) -> (i32, i32) {
    %c0_i32 = arith.constant 0 : i32
    %c0_i32_0 = arith.constant 0 : i32
    return %arg0, %c0_i32 : i32, i32
  }
}

</mosaic_0001>

<bundles_post_ra>
// kernel: inverse_dynamic_model.1
= control target key start
LH: loop header
LB: loop body
LE: loop exit
PB: predicated region body
PF: predicated region fallthrough
CT: control target
= control target key end

     0   :  { %s2057_s30 = smov 0   ;;  %s2059_s10 = smov 0   ;;  %s2503_s0 = inlined_call_operand.vmem [shape: f32[200,16], index: 0, kind: input, shape index: {}]   ;;  %s2504_s1 = inlined_call_operand.vmem [shape: f32[200,16], index: 1, kind: input, shape index: {}]   ;;  %s2505_s2 = inlined_call_operand.vmem [shape: f32[16,32], index: 2, kind: input, shape index: {}]   ;;  %s2506_s3 = inlined_call_operand.vmem [shape: f32[1,32], index: 3, kind: input, shape index: {}]   ;;  %s2507_s4 = inlined_call_operand.vmem [shape: f32[16,32], index: 4, kind: input, shape index: {}]   ;;  %s2508_s5 = inlined_call_operand.vmem [shape: f32[1,32], index: 5, kind: input, shape index: {}]   ;;  %s2509_s6 = inlined_call_operand.vmem [shape: f32[32,4], index: 6, kind: input, shape index: {}]   ;;  %s2510_s7 = inlined_call_operand.vmem [shape: f32[32,4], index: 7, kind: input, shape index: {}]   ;;  %s2511_s8 = inlined_call_operand.vmem [shape: f32[1,4], index: 8, kind: input, shape index: {}]   ;;  %s2512_s9 = inlined_call_operand.vmem [shape: f32[200,4], index: 9, kind: output, shape index: {}]  }
   0x1   :  { %s2061_s11 = smov 0  }
   0x2 LB: > { %s2070_s12 = sadd.s32 4294967295, %s1971_s11   ;;  %s2072_s13 = sadd.s32 1, %s1971_s11   ;;  %s1971_s11 = sphi %s2061_s11, %s2519_s11   ;;  %s1967_s10 = sphi %s2059_s10, %s2518_s10   ;;  %s1963_s30 = sphi %s2057_s30, %s2517_s30  }
   0x3   : > { %s222_s14 = ssub.s32 %s1971_s11, %s2072_s13  ;;  %s225_s15 = sadd.s32 1, %s1967_s10 }
   0x4   : > { %p223_p0 = scmp.eq.s32.totalorder %s222_s14, 0  ;;  %p235_p1 = scmp.ne.s32.totalorder %s1967_s10, %s1963_s30 }
   0x5   : > { %p236_p2 = scmp.eq.s32.totalorder %s2070_s12, 1  ;;  %p1480_p3 = scmp.ge.s32.totalorder %s1971_s11, 1 }
   0x6   : > { %s2080_s16 = scalar_select %p223_p0, %s1967_s10, %s225_s15  }
   0x7   : > { %p2082_p4 = por %p236_p2, %p235_p1  ;;  %p315_p5 = scmp.lt.s32.totalorder %s1971_s11, 3 }
   0x9   : > { %p316_p6 = pnand %p1480_p3, %p315_p5 }
   0xa   : > { %s2093_s22 = smul.u32 (!%p316_p6), 13, %s2070_s12  ;;  %s360_s29 = sand.u32 (!%p316_p6), 1, %s1963_s30  }
   0xb   : > { %319 = sbr.rel (%p316_p6) target bundleno = 534 (0x216), region = 56 }
   0xc   : > { %p368_p7 = scmp.lt.s32.totalorder (!%p316_p6), %s2093_s22, 24  ;;  %s1795_s11 = smul.u32 (!%p316_p6), 104, %s360_s29 }
   0xe   : > { %s2377_s30 = scalar_lea.vmem (!%p316_p6), [#allocation2], %s1795_s11  }
  0x10   : > { %v423_v0 = vld [vmem:[%s2505_s2 + $0x8] sm:$0xff]  ;;  %v2005_v2 = vmov 0.0   ;;  %v422_v3 = vld [vmem:[%s2505_s2] sm:$0xff]  ;;  %vm2006_vm0 = vmmov 0   ;;  %s369_s27 = scalar_select %p368_p7, %s2093_s22, 24  ;;  %vm431_vm1 = vcmask 130048  }
  0x11   : > { %v615_v1 = vld [vmem:[%s2507_s4 + $0x8] sm:$0xff]  ;;  %1615 = vmatprep.subr.mxu0 %v2005_v2  ;;  %1658 = vmatprep.subr.mxu1 %v2005_v2  ;;  %v614_v4 = vld [vmem:[%s2507_s4] sm:$0xff]  ;;  %v812_v5 = vld [vmem:[%s2510_s7 + $0x18] sm:$0xff]  ;;  %vm813_vm2 = vcmask 261120   ;;  %vm1185_vm3 = vcmask 31744   ;;  %s1207_s15 = ssub.s32 (%p2082_p4), 25, %s2093_s22 }
  0x12   : > { %1616 = vmatpush3.msra.mxu0 %v423_v0  ;;  %1659 = vmatpush3.msra.mxu1 %v615_v1  ;;  %s1481_s28 = sshll.u32 %s369_s27, 3  ;;  %v808_v8 = vld [vmem:[%s2509_s6 + $0x18] sm:$0xff]  ;;  %v811_v11 = vld [vmem:[%s2510_s7 + $0x10] sm:$0xff]  ;;  %v810_v15 = vld [vmem:[%s2510_s7 + $0x8] sm:$0xff]  ;;  %s1550_s18 = smul.u32 (%p2082_p4), 104, %s2070_s12 }
  0x13   : > { %1617 = vmatprep.subr.mxu0 %v2005_v2  ;;  %1660 = vmatprep.subr.mxu1 %v2005_v2  ;;  %s2116_s14 = scalar_lea.vmem %s2503_s0, %s1481_s28  ;;  %s2121_s19 = scalar_lea.vmem %s2504_s1, %s1481_s28  ;;  %v807_v12 = vld [vmem:[%s2509_s6 + $0x10] sm:$0xff]  ;;  %v806_v16 = vld [vmem:[%s2509_s6 + $0x8] sm:$0xff]  ;;  %v809_v19 = vld [vmem:[%s2510_s7] sm:$0xff] }
  0x14   : > { %1618 = vmatpush3.msra.mxu0 %v422_v3  ;;  %1619 = vmatprep.mubr.msk.f32.mxu0 %vm2006_vm0, %v2005_v2  ;;  %v396_v6 = vld [vmem:[%s2116_s14] sm:$0xff]  ;;  %v397_v9 = vld [vmem:[%s2116_s14 + $0x8] sm:$0xff]  ;;  %v398_v13 = vld [vmem:[%s2116_s14 + $0x10] sm:$0xff]  ;;  %p1208_p8 = scmp.lt.s32.totalorder (%p2082_p4), %s1207_s15, 13  ;;  %s2421_s23 = scalar_lea.vmem (%p2082_p4), %s2512_s9, %s1550_s18  }
  0x15   : > { %1661 = vmatpush3.msra.mxu1 %v614_v4  ;;  %1662 = vmatprep.mubr.msk.f32.mxu1 %vm2006_vm0, %v2005_v2  ;;  %v409_v7 = vld [vmem:[%s2121_s19] sm:$0xff]  ;;  %v410_v10 = vld [vmem:[%s2121_s19 + $0x8] sm:$0xff]  ;;  %v411_v14 = vld [vmem:[%s2121_s19 + $0x10] sm:$0xff] }
  0x16   : > { %1701 = vmatprep.subr.mxu0 %v2005_v2  ;;  %1748 = vmatprep.subr.mxu1 %v2005_v2  ;;  %v399_v17 = vld [vmem:[%s2116_s14 + $0x18] sm:$0xff]  ;;  %v805_v20 = vld [vmem:[%s2509_s6] sm:$0xff]  ;;  %v401_v23 = vld [vmem:[%s2116_s14 + $0x28] sm:$0xff] }
  0x17   : > { %1620 = vmatmul.mubr.msk.f32.vlgmr.msra.gmra.mxu0 %vm431_vm1, %v396_v6  ;;  %1663 = vmatmul.mubr.msk.f32.vlgmr.msra.gmra.mxu1 %vm431_vm1, %v409_v7  ;;  %v412_v18 = vld [vmem:[%s2121_s19 + $0x18] sm:$0xff]  ;;  %v400_v21 = vld [vmem:[%s2116_s14 + $0x20] sm:$0xff]  ;;  %v414_v24 = vld [vmem:[%s2121_s19 + $0x28] sm:$0xff] }
  0x18   : > { %1622 = vmatprep.mubr.msk.f32.mxu0 %vm2006_vm0, %v2005_v2  ;;  %1665 = vmatprep.mubr.msk.f32.mxu1 %vm2006_vm0, %v2005_v2  ;;  %v413_v22 = vld [vmem:[%s2121_s19 + $0x20] sm:$0xff]  ;;  %v402_v25 = vld [vmem:[%s2116_s14 + $0x30] sm:$0xff]  ;;  %v403_v27 = vld [vmem:[%s2116_s14 + $0x38] sm:$0xff] }
  0x19   : > { %1702 = vmatpush3.msra.mxu0 %v812_v5  ;;  %1749 = vmatpush3.msra.mxu1 %v808_v8  ;;  %v415_v26 = vld [vmem:[%s2121_s19 + $0x30] sm:$0xff]  ;;  %v416_v28 = vld [vmem:[%s2121_s19 + $0x38] sm:$0xff]  ;;  %v404_v29 = vld [vmem:[%s2116_s14 + $0x40] sm:$0xff] }
  0x1a   : > { %1703 = vmatprep.subr.mxu0 %v2005_v2  ;;  %1750 = vmatprep.subr.mxu1 %v2005_v2  ;;  %v417_v30 = vld [vmem:[%s2121_s19 + $0x40] sm:$0xff]  ;;  %v405_v31 = vld [vmem:[%s2116_s14 + $0x48] sm:$0xff]  ;;  %v406_v33 = vld [vmem:[%s2116_s14 + $0x50] sm:$0xff] }
  0x1b   : > { %1623 = vmatmul.mubr.msk.f32.gmra.mxu0 %vm431_vm1, %v397_v9  ;;  %1666 = vmatmul.mubr.msk.f32.gmra.mxu1 %vm431_vm1, %v410_v10  ;;  %v418_v32 = vld [vmem:[%s2121_s19 + $0x48] sm:$0xff]  ;;  %v419_v34 = vld [vmem:[%s2121_s19 + $0x50] sm:$0xff]  ;;  %v407_v35 = vld [vmem:[%s2116_s14 + $0x58] sm:$0xff] }
  0x1c   : > { %1625 = vmatprep.mubr.msk.f32.mxu0 %vm2006_vm0, %v2005_v2  ;;  %1668 = vmatprep.mubr.msk.f32.mxu1 %vm2006_vm0, %v2005_v2  ;;  %v420_v36 = vld [vmem:[%s2121_s19 + $0x58] sm:$0xff]  ;;  %v408_v37 = vld [vmem:[%s2116_s14 + $0x60] sm:$0xff] }
  0x1d   : > { %1704 = vmatpush3.msra.mxu0 %v811_v11  ;;  %1751 = vmatpush3.msra.mxu1 %v807_v12  ;;  %v421_v38 = vld [vmem:[%s2121_s19 + $0x60] sm:$0xff] }
  0x1e   : > { %1705 = vmatprep.subr.mxu0 %v2005_v2  ;;  %1752 = vmatprep.subr.mxu1 %v2005_v2  ;;  %v2260_v39 = vld [vmem:[%s2506_s3] ss:$0 sm:$0xff] }
  0x1f   : > { %1626 = vmatmul.mubr.msk.f32.gmra.mxu0 %vm431_vm1, %v398_v13  ;;  %1669 = vmatmul.mubr.msk.f32.gmra.mxu1 %vm431_vm1, %v411_v14  ;;  %v2265_v40 = vld [vmem:[%s2508_s5] ss:$0 sm:$0xff] }
  0x20   : > { %1628 = vmatprep.mubr.msk.f32.mxu0 %vm2006_vm0, %v2005_v2  ;;  %1671 = vmatprep.mubr.msk.f32.mxu1 %vm2006_vm0, %v2005_v2 }
  0x21   : > { %1706 = vmatpush3.msra.mxu0 %v810_v15  ;;  %1753 = vmatpush3.msra.mxu1 %v806_v16 }
  0x22   : > { %1707 = vmatprep.subr.mxu0 %v2005_v2  ;;  %1754 = vmatprep.subr.mxu1 %v2005_v2 }
  0x23   : > { %1629 = vmatmul.mubr.msk.f32.gmra.mxu0 %vm431_vm1, %v399_v17  ;;  %1672 = vmatmul.mubr.msk.f32.gmra.mxu1 %vm431_vm1, %v412_v18 }
  0x24   : > { %1631 = vmatprep.mubr.msk.f32.mxu0 %vm2006_vm0, %v2005_v2  ;;  %1674 = vmatprep.mubr.msk.f32.mxu1 %vm2006_vm0, %v2005_v2 }
  0x25   : > { %1708 = vmatpush3.msra.mxu0 %v809_v19  ;;  %1755 = vmatpush3.msra.mxu1 %v805_v20 }
  0x27   : > { %1632 = vmatmul.mubr.msk.f32.gmra.mxu0 %vm431_vm1, %v400_v21  ;;  %1675 = vmatmul.mubr.msk.f32.gmra.mxu1 %vm431_vm1, %v413_v22 }
  0x28   : > { %1634 = vmatprep.mubr.msk.f32.mxu0 %vm2006_vm0, %v2005_v2  ;;  %1677 = vmatprep.mubr.msk.f32.mxu1 %vm2006_vm0, %v2005_v2 }
  0x2b   : > { %1635 = vmatmul.mubr.msk.f32.gmra.mxu0 %vm431_vm1, %v401_v23  ;;  %1678 = vmatmul.mubr.msk.f32.gmra.mxu1 %vm431_vm1, %v414_v24 }
  0x2c   : > { %1637 = vmatprep.mubr.msk.f32.mxu0 %vm2006_vm0, %v2005_v2  ;;  %1680 = vmatprep.mubr.msk.f32.mxu1 %vm2006_vm0, %v2005_v2 }
  0x2f   : > { %1638 = vmatmul.mubr.msk.f32.gmra.mxu0 %vm431_vm1, %v402_v25  ;;  %1681 = vmatmul.mubr.msk.f32.gmra.mxu1 %vm431_vm1, %v415_v26 }
  0x30   : > { %1640 = vmatprep.mubr.msk.f32.mxu0 %vm2006_vm0, %v2005_v2  ;;  %1683 = vmatprep.mubr.msk.f32.mxu1 %vm2006_vm0, %v2005_v2 }
  0x33   : > { %1641 = vmatmul.mubr.msk.f32.gmra.mxu0 %vm431_vm1, %v403_v27  ;;  %1684 = vmatmul.mubr.msk.f32.gmra.mxu1 %vm431_vm1, %v416_v28 }
  0x34   : > { %1643 = vmatprep.mubr.msk.f32.mxu0 %vm2006_vm0, %v2005_v2  ;;  %1686 = vmatprep.mubr.msk.f32.mxu1 %vm2006_vm0, %v2005_v2 }
  0x37   : > { %1644 = vmatmul.mubr.msk.f32.gmra.mxu0 %vm431_vm1, %v404_v29  ;;  %1687 = vmatmul.mubr.msk.f32.gmra.mxu1 %vm431_vm1, %v417_v30 }
  0x38   : > { %1646 = vmatprep.mubr.msk.f32.mxu0 %vm2006_vm0, %v2005_v2  ;;  %1689 = vmatprep.mubr.msk.f32.mxu1 %vm2006_vm0, %v2005_v2 }
  0x3b   : > { %1647 = vmatmul.mubr.msk.f32.gmra.mxu0 %vm431_vm1, %v405_v31  ;;  %1690 = vmatmul.mubr.msk.f32.gmra.mxu1 %vm431_vm1, %v418_v32 }
  0x3c   : > { %1649 = vmatprep.mubr.msk.f32.mxu0 %vm2006_vm0, %v2005_v2  ;;  %1692 = vmatprep.mubr.msk.f32.mxu1 %vm2006_vm0, %v2005_v2 }
  0x3f   : > { %1650 = vmatmul.mubr.msk.f32.gmra.mxu0 %vm431_vm1, %v406_v33  ;;  %1693 = vmatmul.mubr.msk.f32.gmra.mxu1 %vm431_vm1, %v419_v34 }
  0x40   : > { %1652 = vmatprep.mubr.msk.f32.mxu0 %vm2006_vm0, %v2005_v2  ;;  %1695 = vmatprep.mubr.msk.f32.mxu1 %vm2006_vm0, %v2005_v2 }
  0x43   : > { %1653 = vmatmul.mubr.msk.f32.gmra.mxu0 %vm431_vm1, %v407_v35  ;;  %1696 = vmatmul.mubr.msk.f32.gmra.mxu1 %vm431_vm1, %v420_v36 }
  0x44   : > { %1655 = vmatprep.mubr.msk.f32.mxu0 %vm2006_vm0, %v2005_v2  ;;  %1698 = vmatprep.mubr.msk.f32.mxu1 %vm2006_vm0, %v2005_v2 }
  0x47   : > { %1656 = vmatmul.mubr.msk.f32.gmra.mxu0 %vm431_vm1, %v408_v37  ;;  %1699 = vmatmul.mubr.msk.f32.gmra.mxu1 %vm431_vm1, %v421_v38 }
  0x48   : > { %1709 = vmatprep.mubr.msk.f32.mxu0 %vm2006_vm0, %v2005_v2  ;;  %1756 = vmatprep.mubr.msk.f32.mxu1 %vm2006_vm0, %v2005_v2 }
  0xd7   : > { %v537_v41 = vpop.f32.mrf.mxu0  ;;  %v728_v42 = vpop.f32.mrf.mxu1 }
  0xd8   : > { %v538_v43 = vadd.f32 %v2260_v39, %v537_v41  ;;  %v729_v44 = vadd.f32 %v2265_v40, %v728_v42 }
  0xd9   : > { %v1621_v45 = vpop.f32.mrf.mxu0  ;;  %v1664_v46 = vpop.f32.mrf.mxu1 }
  0xda   : > { %v601_v47 = vmax.f32 %v538_v43, 0.0  ;;  %v792_v48 = vmax.f32 %v729_v44, 0.0 }
  0xdb   : > { %v542_v49 = vpop.f32.mrf.mxu0  ;;  %v733_v50 = vpop.f32.mrf.mxu1 }
  0xdc   : > { %v543_v51 = vadd.f32 %v2260_v39, %v542_v49  ;;  %v734_v52 = vadd.f32 %v2265_v40, %v733_v50  ;;  %1710 = vmatmul.mubr.msk.f32.vlgmr.msra.gmra.mxu0 %vm813_vm2, %v792_v48  ;;  %1757 = vmatmul.mubr.msk.f32.vlgmr.msra.gmra.mxu1 %vm813_vm2, %v601_v47 }
  0xdd   : > { %v1624_v53 = vpop.f32.mrf.mxu0  ;;  %v1667_v54 = vpop.f32.mrf.mxu1  ;;  %1712 = vmatprep.mubr.msk.f32.mxu0 %vm2006_vm0, %v2005_v2  ;;  %1759 = vmatprep.mubr.msk.f32.mxu1 %vm2006_vm0, %v2005_v2 }
  0xde   : > { %v602_v55 = vmax.f32 %v543_v51, 0.0  ;;  %v793_v56 = vmax.f32 %v734_v52, 0.0 }
  0xdf   : > { %v547_v57 = vpop.f32.mrf.mxu0  ;;  %v738_v58 = vpop.f32.mrf.mxu1 }
  0xe0   : > { %v548_v59 = vadd.f32 %v2260_v39, %v547_v57  ;;  %v739_v60 = vadd.f32 %v2265_v40, %v738_v58  ;;  %1713 = vmatmul.mubr.msk.f32.gmra.mxu0 %vm813_vm2, %v793_v56  ;;  %1760 = vmatmul.mubr.msk.f32.gmra.mxu1 %vm813_vm2, %v602_v55 }
  0xe1   : > { %v1627_v61 = vpop.f32.mrf.mxu0  ;;  %v1670_v62 = vpop.f32.mrf.mxu1  ;;  %1715 = vmatprep.mubr.msk.f32.mxu0 %vm2006_vm0, %v2005_v2  ;;  %1762 = vmatprep.mubr.msk.f32.mxu1 %vm2006_vm0, %v2005_v2 }
  0xe2   : > { %v603_v63 = vmax.f32 %v548_v59, 0.0  ;;  %v794_v0 = vmax.f32 %v739_v60, 0.0 }
  0xe3   : > { %v552_v1 = vpop.f32.mrf.mxu0  ;;  %v743_v3 = vpop.f32.mrf.mxu1 }
  0xe4   : > { %v553_v4 = vadd.f32 %v2260_v39, %v552_v1  ;;  %v744_v5 = vadd.f32 %v2265_v40, %v743_v3  ;;  %1716 = vmatmul.mubr.msk.f32.gmra.mxu0 %vm813_vm2, %v794_v0  ;;  %1763 = vmatmul.mubr.msk.f32.gmra.mxu1 %vm813_vm2, %v603_v63 }
  0xe5   : > { %v1630_v6 = vpop.f32.mrf.mxu0  ;;  %v1673_v7 = vpop.f32.mrf.mxu1  ;;  %1718 = vmatprep.mubr.msk.f32.mxu0 %vm2006_vm0, %v2005_v2  ;;  %1765 = vmatprep.mubr.msk.f32.mxu1 %vm2006_vm0, %v2005_v2 }
  0xe6   : > { %v604_v8 = vmax.f32 %v553_v4, 0.0  ;;  %v795_v9 = vmax.f32 %v744_v5, 0.0 }
  0xe7   : > { %v557_v10 = vpop.f32.mrf.mxu0  ;;  %v748_v11 = vpop.f32.mrf.mxu1 }
  0xe8   : > { %v558_v12 = vadd.f32 %v2260_v39, %v557_v10  ;;  %v749_v13 = vadd.f32 %v2265_v40, %v748_v11  ;;  %1719 = vmatmul.mubr.msk.f32.gmra.mxu0 %vm813_vm2, %v795_v9  ;;  %1766 = vmatmul.mubr.msk.f32.gmra.mxu1 %vm813_vm2, %v604_v8 }
  0xe9   : > { %v1633_v14 = vpop.f32.mrf.mxu0  ;;  %v1676_v15 = vpop.f32.mrf.mxu1  ;;  %1721 = vmatprep.mubr.msk.f32.mxu0 %vm2006_vm0, %v2005_v2  ;;  %1768 = vmatprep.mubr.msk.f32.mxu1 %vm2006_vm0, %v2005_v2 }
  0xea   : > { %v605_v16 = vmax.f32 %v558_v12, 0.0  ;;  %v796_v17 = vmax.f32 %v749_v13, 0.0 }
  0xeb   : > { %v562_v18 = vpop.f32.mrf.mxu0  ;;  %v753_v19 = vpop.f32.mrf.mxu1 }
  0xec   : > { %v563_v20 = vadd.f32 %v2260_v39, %v562_v18  ;;  %v754_v21 = vadd.f32 %v2265_v40, %v753_v19  ;;  %1722 = vmatmul.mubr.msk.f32.gmra.mxu0 %vm813_vm2, %v796_v17  ;;  %1769 = vmatmul.mubr.msk.f32.gmra.mxu1 %vm813_vm2, %v605_v16 }
  0xed   : > { %v1636_v22 = vpop.f32.mrf.mxu0  ;;  %v1679_v23 = vpop.f32.mrf.mxu1  ;;  %1724 = vmatprep.mubr.msk.f32.mxu0 %vm2006_vm0, %v2005_v2  ;;  %1771 = vmatprep.mubr.msk.f32.mxu1 %vm2006_vm0, %v2005_v2 }
  0xee   : > { %v606_v24 = vmax.f32 %v563_v20, 0.0  ;;  %v797_v25 = vmax.f32 %v754_v21, 0.0  ;;  %v2370_v21 = vld [vmem:[%s2511_s8] ss:$0 sm:$0xff] }
  0xef   : > { %v567_v26 = vpop.f32.mrf.mxu0  ;;  %v758_v27 = vpop.f32.mrf.mxu1 }
  0xf0   : > { %v568_v28 = vadd.f32 %v2260_v39, %v567_v26  ;;  %v759_v29 = vadd.f32 %v2265_v40, %v758_v27  ;;  %1725 = vmatmul.mubr.msk.f32.gmra.mxu0 %vm813_vm2, %v797_v25  ;;  %1772 = vmatmul.mubr.msk.f32.gmra.mxu1 %vm813_vm2, %v606_v24 }
  0xf1   : > { %v1639_v30 = vpop.f32.mrf.mxu0  ;;  %v1682_v31 = vpop.f32.mrf.mxu1  ;;  %1727 = vmatprep.mubr.msk.f32.mxu0 %vm2006_vm0, %v2005_v2  ;;  %1774 = vmatprep.mubr.msk.f32.mxu1 %vm2006_vm0, %v2005_v2 }
  0xf2   : > { %v607_v32 = vmax.f32 %v568_v28, 0.0  ;;  %v798_v33 = vmax.f32 %v759_v29, 0.0 }
  0xf3   : > { %v572_v34 = vpop.f32.mrf.mxu0  ;;  %v763_v35 = vpop.f32.mrf.mxu1 }
  0xf4   : > { %v573_v36 = vadd.f32 %v2260_v39, %v572_v34  ;;  %v764_v37 = vadd.f32 %v2265_v40, %v763_v35  ;;  %1728 = vmatmul.mubr.msk.f32.gmra.mxu0 %vm813_vm2, %v798_v33  ;;  %1775 = vmatmul.mubr.msk.f32.gmra.mxu1 %vm813_vm2, %v607_v32 }
  0xf5   : > { %v1642_v38 = vpop.f32.mrf.mxu0  ;;  %v1685_v41 = vpop.f32.mrf.mxu1  ;;  %1730 = vmatprep.mubr.msk.f32.mxu0 %vm2006_vm0, %v2005_v2  ;;  %1777 = vmatprep.mubr.msk.f32.mxu1 %vm2006_vm0, %v2005_v2 }
  0xf6   : > { %v608_v42 = vmax.f32 %v573_v36, 0.0  ;;  %v799_v43 = vmax.f32 %v764_v37, 0.0 }
  0xf7   : > { %v577_v44 = vpop.f32.mrf.mxu0  ;;  %v768_v45 = vpop.f32.mrf.mxu1 }
  0xf8   : > { %v578_v46 = vadd.f32 %v2260_v39, %v577_v44  ;;  %v769_v47 = vadd.f32 %v2265_v40, %v768_v45  ;;  %1731 = vmatmul.mubr.msk.f32.gmra.mxu0 %vm813_vm2, %v799_v43  ;;  %1778 = vmatmul.mubr.msk.f32.gmra.mxu1 %vm813_vm2, %v608_v42 }
  0xf9   : > { %v1645_v48 = vpop.f32.mrf.mxu0  ;;  %v1688_v49 = vpop.f32.mrf.mxu1  ;;  %1733 = vmatprep.mubr.msk.f32.mxu0 %vm2006_vm0, %v2005_v2  ;;  %1780 = vmatprep.mubr.msk.f32.mxu1 %vm2006_vm0, %v2005_v2 }
  0xfa   : > { %v609_v50 = vmax.f32 %v578_v46, 0.0  ;;  %v800_v51 = vmax.f32 %v769_v47, 0.0 }
  0xfb   : > { %v582_v52 = vpop.f32.mrf.mxu0  ;;  %v773_v53 = vpop.f32.mrf.mxu1 }
  0xfc   : > { %v583_v54 = vadd.f32 %v2260_v39, %v582_v52  ;;  %v774_v55 = vadd.f32 %v2265_v40, %v773_v53  ;;  %1734 = vmatmul.mubr.msk.f32.gmra.mxu0 %vm813_vm2, %v800_v51  ;;  %1781 = vmatmul.mubr.msk.f32.gmra.mxu1 %vm813_vm2, %v609_v50 }
  0xfd   : > { %v1648_v56 = vpop.f32.mrf.mxu0  ;;  %v1691_v57 = vpop.f32.mrf.mxu1  ;;  %1736 = vmatprep.mubr.msk.f32.mxu0 %vm2006_vm0, %v2005_v2  ;;  %1783 = vmatprep.mubr.msk.f32.mxu1 %vm2006_vm0, %v2005_v2 }
  0xfe   : > { %v610_v58 = vmax.f32 %v583_v54, 0.0  ;;  %v801_v59 = vmax.f32 %v774_v55, 0.0 }
  0xff   : > { %v587_v60 = vpop.f32.mrf.mxu0  ;;  %v778_v61 = vpop.f32.mrf.mxu1 }
 0x100   : > { %v588_v62 = vadd.f32 %v2260_v39, %v587_v60  ;;  %v779_v63 = vadd.f32 %v2265_v40, %v778_v61  ;;  %1737 = vmatmul.mubr.msk.f32.gmra.mxu0 %vm813_vm2, %v801_v59  ;;  %1784 = vmatmul.mubr.msk.f32.gmra.mxu1 %vm813_vm2, %v610_v58 }
 0x101   : > { %v1651_v0 = vpop.f32.mrf.mxu0  ;;  %v1694_v1 = vpop.f32.mrf.mxu1  ;;  %1739 = vmatprep.mubr.msk.f32.mxu0 %vm2006_vm0, %v2005_v2  ;;  %1786 = vmatprep.mubr.msk.f32.mxu1 %vm2006_vm0, %v2005_v2 }
 0x102   : > { %v611_v3 = vmax.f32 %v588_v62, 0.0  ;;  %v802_v4 = vmax.f32 %v779_v63, 0.0 }
 0x103   : > { %v592_v5 = vpop.f32.mrf.mxu0  ;;  %v783_v6 = vpop.f32.mrf.mxu1 }
 0x104   : > { %v593_v7 = vadd.f32 %v2260_v39, %v592_v5  ;;  %v784_v8 = vadd.f32 %v2265_v40, %v783_v6  ;;  %1740 = vmatmul.mubr.msk.f32.gmra.mxu0 %vm813_vm2, %v802_v4  ;;  %1787 = vmatmul.mubr.msk.f32.gmra.mxu1 %vm813_vm2, %v611_v3 }
 0x105   : > { %v1654_v9 = vpop.f32.mrf.mxu0  ;;  %v1697_v10 = vpop.f32.mrf.mxu1  ;;  %1742 = vmatprep.mubr.msk.f32.mxu0 %vm2006_vm0, %v2005_v2  ;;  %1789 = vmatprep.mubr.msk.f32.mxu1 %vm2006_vm0, %v2005_v2 }
 0x106   : > { %v612_v11 = vmax.f32 %v593_v7, 0.0  ;;  %v803_v12 = vmax.f32 %v784_v8, 0.0 }
 0x107   : > { %v597_v13 = vpop.f32.mrf.mxu0  ;;  %v788_v14 = vpop.f32.mrf.mxu1 }
 0x108   : > { %v598_v15 = vadd.f32 %v2260_v39, %v597_v13  ;;  %v789_v16 = vadd.f32 %v2265_v40, %v788_v14  ;;  %1743 = vmatmul.mubr.msk.f32.gmra.mxu0 %vm813_vm2, %v803_v12  ;;  %1790 = vmatmul.mubr.msk.f32.gmra.mxu1 %vm813_vm2, %v612_v11 }
 0x109   : > { %v1657_v17 = vpop.f32.mrf.mxu0  ;;  %v1700_v18 = vpop.f32.mrf.mxu1  ;;  %1745 = vmatprep.mubr.msk.f32.mxu0 %vm2006_vm0, %v2005_v2  ;;  %1792 = vmatprep.mubr.msk.f32.mxu1 %vm2006_vm0, %v2005_v2 }
 0x10a   : > { %v613_v19 = vmax.f32 %v598_v15, 0.0  ;;  %v804_v20 = vmax.f32 %v789_v16, 0.0 }
 0x10c   : > { %1746 = vmatmul.mubr.msk.f32.gmra.mxu0 %vm813_vm2, %v804_v20  ;;  %1793 = vmatmul.mubr.msk.f32.gmra.mxu1 %vm813_vm2, %v613_v19 }
 0x19c   : > { %v919_v39 = vpop.f32.mrf.mxu0  ;;  %v1088_v40 = vpop.f32.mrf.mxu1 }
 0x19d   : > { %v1089_v22 = vadd.f32 %v1088_v40, %v919_v39 }
 0x19e   : > { %v1711_v23 = vpop.f32.mrf.mxu0  ;;  %v1758_v24 = vpop.f32.mrf.mxu1 }
 0x19f   : > { %v1159_v25 = vadd.f32 %v2370_v21, %v1089_v22 }
 0x1a0   : > { %v924_v2 = vpop.f32.mrf.mxu0  ;;  %v1093_v26 = vpop.f32.mrf.mxu1 }
 0x1a1   : > { %1887 = vtanh.f32 %v1159_v25  ;;  %v1094_v27 = vadd.f32 %v1093_v26, %v924_v2 }
 0x1a2   : > { %v1714_v28 = vpop.f32.mrf.mxu0  ;;  %v1761_v29 = vpop.f32.mrf.mxu1 }
 0x1a3   : > { %v1160_v30 = vadd.f32 %v2370_v21, %v1094_v27 }
 0x1a4   : > { %v929_v31 = vpop.f32.mrf.mxu0  ;;  %v1098_v32 = vpop.f32.mrf.mxu1 }
 0x1a5   : > { %1889 = vtanh.f32 %v1160_v30  ;;  %v1099_v33 = vadd.f32 %v1098_v32, %v929_v31 }
 0x1a6   : > { %v1717_v34 = vpop.f32.mrf.mxu0  ;;  %v1764_v35 = vpop.f32.mrf.mxu1 }
 0x1a7   : > { %v1161_v36 = vadd.f32 %v2370_v21, %v1099_v33 }
 0x1a8   : > { %v934_v37 = vpop.f32.mrf.mxu0  ;;  %v1103_v38 = vpop.f32.mrf.mxu1 }
 0x1a9   : > { %1891 = vtanh.f32 %v1161_v36  ;;  %v1104_v41 = vadd.f32 %v1103_v38, %v934_v37 }
 0x1aa   : > { %v1720_v42 = vpop.f32.mrf.mxu0  ;;  %v1767_v43 = vpop.f32.mrf.mxu1 }
 0x1ab   : > { %v1162_v44 = vadd.f32 %v2370_v21, %v1104_v41 }
 0x1ac   : > { %v939_v45 = vpop.f32.mrf.mxu0  ;;  %v1108_v46 = vpop.f32.mrf.mxu1 }
 0x1ad   : > { %1893 = vtanh.f32 %v1162_v44  ;;  %v1109_v47 = vadd.f32 %v1108_v46, %v939_v45 }
 0x1ae   : > { %v1888_v48 = vpop.eup %1887  ;;  %v1723_v49 = vpop.f32.mrf.mxu0 }
 0x1af   : > { %v1770_v50 = vpop.f32.mrf.mxu1  ;;  %1186 = vst.msk [vmem:[%s2377_s30] sm:$0xff] %vm1185_vm3, %v1888_v48  ;;  %v1163_v51 = vadd.f32 %v2370_v21, %v1109_v47 }
 0x1b0   : > { %v944_v52 = vpop.f32.mrf.mxu0 }
 0x1b1   : > { %v1113_v53 = vpop.f32.mrf.mxu1  ;;  %1895 = vtanh.f32 %v1163_v51 }
 0x1b2   : > { %v1114_v54 = vadd.f32 %v1113_v53, %v944_v52  ;;  %v1890_v55 = vpop.eup %1889  ;;  %v1726_v56 = vpop.f32.mrf.mxu0 }
 0x1b3   : > { %v1773_v57 = vpop.f32.mrf.mxu1  ;;  %1187 = vst.msk [vmem:[%s2377_s30 + $0x8] sm:$0xff] %vm1185_vm3, %v1890_v55 }
 0x1b4   : > { %v1164_v58 = vadd.f32 %v2370_v21, %v1114_v54  ;;  %v949_v59 = vpop.f32.mrf.mxu0 }
 0x1b5   : > { %v1118_v60 = vpop.f32.mrf.mxu1 }
 0x1b6   : > { %1897 = vtanh.f32 %v1164_v58  ;;  %v1119_v61 = vadd.f32 %v1118_v60, %v949_v59  ;;  %v1892_v62 = vpop.eup %1891  ;;  %v1729_v63 = vpop.f32.mrf.mxu0 }
 0x1b7   : > { %v1776_v0 = vpop.f32.mrf.mxu1  ;;  %1188 = vst.msk [vmem:[%s2377_s30 + $0x10] sm:$0xff] %vm1185_vm3, %v1892_v62 }
 0x1b8   : > { %v1165_v1 = vadd.f32 %v2370_v21, %v1119_v61  ;;  %v954_v3 = vpop.f32.mrf.mxu0 }
 0x1b9   : > { %v1123_v4 = vpop.f32.mrf.mxu1 }
 0x1ba   : > { %1899 = vtanh.f32 %v1165_v1  ;;  %v1124_v5 = vadd.f32 %v1123_v4, %v954_v3  ;;  %v1894_v6 = vpop.eup %1893  ;;  %v1732_v7 = vpop.f32.mrf.mxu0 }
 0x1bb   : > { %v1779_v8 = vpop.f32.mrf.mxu1  ;;  %1189 = vst.msk [vmem:[%s2377_s30 + $0x18] sm:$0xff] %vm1185_vm3, %v1894_v6 }
 0x1bc   : > { %v1166_v9 = vadd.f32 %v2370_v21, %v1124_v5  ;;  %v959_v10 = vpop.f32.mrf.mxu0 }
 0x1bd   : > { %v1128_v11 = vpop.f32.mrf.mxu1 }
 0x1be   : > { %1901 = vtanh.f32 %v1166_v9  ;;  %v1129_v12 = vadd.f32 %v1128_v11, %v959_v10  ;;  %v1896_v13 = vpop.eup %1895  ;;  %v1735_v14 = vpop.f32.mrf.mxu0 }
 0x1bf   : > { %v1782_v15 = vpop.f32.mrf.mxu1  ;;  %1190 = vst.msk [vmem:[%s2377_s30 + $0x20] sm:$0xff] %vm1185_vm3, %v1896_v13 }
 0x1c0   : > { %v1167_v16 = vadd.f32 %v2370_v21, %v1129_v12  ;;  %v964_v17 = vpop.f32.mrf.mxu0 }
 0x1c1   : > { %v1133_v18 = vpop.f32.mrf.mxu1 }
 0x1c2   : > { %1903 = vtanh.f32 %v1167_v16  ;;  %v1134_v19 = vadd.f32 %v1133_v18, %v964_v17  ;;  %v1738_v39 = vpop.f32.mrf.mxu0 }
 0x1c3   : > { %v1898_v20 = vpop.eup %1897  ;;  %v1785_v40 = vpop.f32.mrf.mxu1 }
 0x1c4   : > { %1191 = vst.msk [vmem:[%s2377_s30 + $0x28] sm:$0xff] %vm1185_vm3, %v1898_v20  ;;  %v1168_v22 = vadd.f32 %v2370_v21, %v1134_v19  ;;  %v969_v23 = vpop.f32.mrf.mxu0 }
 0x1c5   : > { %v1138_v24 = vpop.f32.mrf.mxu1 }
 0x1c6   : > { %1905 = vtanh.f32 %v1168_v22  ;;  %v1139_v25 = vadd.f32 %v1138_v24, %v969_v23  ;;  %v1741_v26 = vpop.f32.mrf.mxu0 }
 0x1c7   : > { %v1900_v2 = vpop.eup %1899  ;;  %v1788_v27 = vpop.f32.mrf.mxu1 }
 0x1c8   : > { %1192 = vst.msk [vmem:[%s2377_s30 + $0x30] sm:$0xff] %vm1185_vm3, %v1900_v2  ;;  %v1169_v28 = vadd.f32 %v2370_v21, %v1139_v25  ;;  %v974_v29 = vpop.f32.mrf.mxu0 }
 0x1c9   : > { %v1143_v30 = vpop.f32.mrf.mxu1 }
 0x1ca   : > { %1907 = vtanh.f32 %v1169_v28  ;;  %v1144_v31 = vadd.f32 %v1143_v30, %v974_v29  ;;  %v1744_v33 = vpop.f32.mrf.mxu0 }
 0x1cb   : > { %v1902_v32 = vpop.eup %1901  ;;  %v1791_v34 = vpop.f32.mrf.mxu1 }
 0x1cc   : > { %1193 = vst.msk [vmem:[%s2377_s30 + $0x38] sm:$0xff] %vm1185_vm3, %v1902_v32  ;;  %v1170_v35 = vadd.f32 %v2370_v21, %v1144_v31  ;;  %v979_v36 = vpop.f32.mrf.mxu0 }
 0x1cd   : > { %v1148_v37 = vpop.f32.mrf.mxu1 }
 0x1ce   : > { %1909 = vtanh.f32 %v1170_v35  ;;  %v1149_v38 = vadd.f32 %v1148_v37, %v979_v36  ;;  %v1747_v42 = vpop.f32.mrf.mxu0 }
 0x1cf   : > { %v1904_v41 = vpop.eup %1903  ;;  %v1794_v43 = vpop.f32.mrf.mxu1 }
 0x1d0   : > { %1194 = vst.msk [vmem:[%s2377_s30 + $0x40] sm:$0xff] %vm1185_vm3, %v1904_v41  ;;  %v1171_v44 = vadd.f32 %v2370_v21, %v1149_v38 }
 0x1d2   : > { %1911 = vtanh.f32 %v1171_v44 }
 0x1d3   : > { %v1906_v45 = vpop.eup %1905 }
 0x1d4   : > { %1195 = vst.msk [vmem:[%s2377_s30 + $0x48] sm:$0xff] %vm1185_vm3, %v1906_v45 }
 0x1d7   : > { %v1908_v46 = vpop.eup %1907 }
 0x1d8   : > { %1196 = vst.msk [vmem:[%s2377_s30 + $0x50] sm:$0xff] %vm1185_vm3, %v1908_v46 }
 0x1db   : > { %v1910_v47 = vpop.eup %1909 }
 0x1dc   : > { %1197 = vst.msk [vmem:[%s2377_s30 + $0x58] sm:$0xff] %vm1185_vm3, %v1910_v47  ;;  %1205 = sbr.rel (!%p2082_p4) target bundleno = 534 (0x216), region = 60 }
 0x1df   : > { %v1912_v48 = vpop.eup %1911 }
 0x1e0   : > { %1198 = vst.msk [vmem:[%s2377_s30 + $0x60] sm:$0xff] %vm1185_vm3, %v1912_v48 }
 0x1e1   : > { %s2521_s15 = smov (!%p1208_p8, %s1207_s15), 13 }
 0x1e2   : > { %s1538_s24 = sshll.u32 %s2521_s15, 7 }
 0x1e3   : > { %p1541_p9 = scmp.eq.s32.totalorder %s1538_s24, 0 }
 0x1e4   : > { %1913 = sdivrem.u32 (!%p1541_p9), %s2521_s15, 13 }
 0x1e5   : > { %1216 = sbr.rel (%p1541_p9) target bundleno = 534 (0x216), region = 64 }
 0x1ed   : > { %s2427_s17 = spop.drf %1913 }
 0x1ee   : > { %p1542_p10 = scmp.le.s32.totalorder %s2427_s17, 0 }
 0x1ef   : > { %s2514_s12 = smov (!%p1542_p10), %s2421_s23  ;;  %s2515_s22 = smov (!%p1542_p10), %s2377_s30 }
 0x1f0   : > { %1427 = sbr.rel (%p1542_p10) target bundleno = 509 (0x1fd), region = 143  ;;  %s2436_s25 = smov (!%p1542_p10), 0  }
 0x1f1   : > { %s2438_s26 = smov (!%p1542_p10), 0  }
 0x1f5 LB: >> { %v1305_v21 = vld [vmem:[%s1979_s22] sm:$0xff]  ;;  %v1307_v49 = vld [vmem:[%s1979_s22 + $0x8] sm:$0xff]  ;;  %v1309_v50 = vld [vmem:[%s1979_s22 + $0x10] sm:$0xff]  ;;  %s1331_s27 = sadd.s32 1, %s1983_s25  ;;  %s1299_s26 = sadd.s32 1, %s1987_s26   ;;  %s1987_s26 = sphi %s2438_s26, %s1299_s26   ;;  %s1983_s25 = sphi %s2436_s25, %s2516_s25   ;;  %s1979_s22 = sphi %s2515_s22, %s1336_s22   ;;  %s1975_s12 = sphi %s2514_s12, %s1337_s12  }
 0x1f6   : >> { %1306 = vst [vmem:[%s1975_s12] sm:$0xff] %v1305_v21  ;;  %1308 = vst [vmem:[%s1975_s12 + $0x8] sm:$0xff] %v1307_v49  ;;  %v1311_v51 = vld [vmem:[%s1979_s22 + $0x18] sm:$0xff]  ;;  %v1313_v52 = vld [vmem:[%s1979_s22 + $0x20] sm:$0xff]  ;;  %p1332_p11 = scmp.ge.s32.totalorder %s1331_s27, %s2427_s17  ;;  %p1298_p12 = scmp.ge.s32.totalorder %s1299_s26, %s2427_s17 }
 0x1f7   : >> { %1310 = vst [vmem:[%s1975_s12 + $0x10] sm:$0xff] %v1309_v50  ;;  %v1315_v53 = vld [vmem:[%s1979_s22 + $0x28] sm:$0xff]  ;;  %1312 = vst [vmem:[%s1975_s12 + $0x18] sm:$0xff] %v1311_v51  ;;  %v1317_v54 = vld [vmem:[%s1979_s22 + $0x30] sm:$0xff] }
 0x1f8   : >> { %1314 = vst [vmem:[%s1975_s12 + $0x20] sm:$0xff] %v1313_v52  ;;  %1316 = vst [vmem:[%s1975_s12 + $0x28] sm:$0xff] %v1315_v53  ;;  %v1319_v55 = vld [vmem:[%s1979_s22 + $0x38] sm:$0xff]  ;;  %v1321_v56 = vld [vmem:[%s1979_s22 + $0x40] sm:$0xff]  ;;  %s2523_s27 = smov (%p1332_p11, %s1331_s27), 0  ;;  %1301 = sbr.rel (!%p1298_p12) target bundleno = 501 (0x1f5), region = 149 }
 0x1f9   : >> { %1318 = vst [vmem:[%s1975_s12 + $0x30] sm:$0xff] %v1317_v54  ;;  %1320 = vst [vmem:[%s1975_s12 + $0x38] sm:$0xff] %v1319_v55  ;;  %v1323_v57 = vld [vmem:[%s1979_s22 + $0x48] sm:$0xff]  ;;  %v1325_v58 = vld [vmem:[%s1979_s22 + $0x50] sm:$0xff]  ;;  %s1334_s28 = smul.u32 104, %s2523_s27  ;;  %s2516_s25 = smov %s2523_s27 }
 0x1fa   : >> { %1322 = vst [vmem:[%s1975_s12 + $0x40] sm:$0xff] %v1321_v56  ;;  %v1327_v59 = vld [vmem:[%s1979_s22 + $0x58] sm:$0xff]  ;;  %1324 = vst [vmem:[%s1975_s12 + $0x48] sm:$0xff] %v1323_v57  ;;  %v1329_v60 = vld [vmem:[%s1979_s22 + $0x60] sm:$0xff] }
 0x1fb   : >> { %1326 = vst [vmem:[%s1975_s12 + $0x50] sm:$0xff] %v1325_v58  ;;  %1328 = vst [vmem:[%s1975_s12 + $0x58] sm:$0xff] %v1327_v59  ;;  %s1336_s22 = scalar_lea.vmem %s2377_s30, %s1334_s28 [#allocation2]  }
 0x1fc   : >> { %1330 = vst [vmem:[%s1975_s12 + $0x60] sm:$0xff] %v1329_v60  ;;  %s1337_s12 = scalar_lea.vmem %s2421_s23, %s1334_s28  }
 0x1fd PF: > { %1915 = sdivrem.u32 %s2521_s15, 13 }
 0x1fe   : > { %s1543_s14 = smul.u32 104, %s2427_s17 }
 0x200   : > { %s1342_s19 = scalar_lea.vmem %s2377_s30, %s1543_s14 [#allocation2]   ;;  %s1344_s29 = scalar_lea.vmem %s2421_s23, %s1543_s14  }
 0x206   : > { %s1916_s11 = spop.drf %1915 }
 0x207   : > { %p1545_p13 = scmp.le.s32.totalorder %s1916_s11, 0 }
 0x208   : > { %s1989_s18 = smov (!%p1545_p13), %s1344_s29   ;;  %s1993_s20 = smov (!%p1545_p13), %s1342_s19  }
 0x209   : > { %1441 = sbr.rel (%p1545_p13) target bundleno = 534 (0x216), region = 154  ;;  %s1997_s21 = smov (!%p1545_p13), 0  }
 0x20a   : > { %s2001_s24 = smov (!%p1545_p13), 0  }
 0x20e LB: >> { %v1354_v61 = vld [vmem:[%s1995_s20] sm:$0xff]  ;;  %s1356_s12 = sadd.s32 1, %s1999_s21  ;;  %s1348_s24 = sadd.s32 1, %s2003_s24   ;;  %s2003_s24 = sphi %s2001_s24, %s1348_s24   ;;  %s1999_s21 = sphi %s1997_s21, %s1998_s21   ;;  %s1995_s20 = sphi %s1993_s20, %s1361_s20   ;;  %s1991_s18 = sphi %s1989_s18, %s1362_s18  }
 0x20f   : >> { %1355 = vst [vmem:[%s1991_s18] sm:$0xff] %v1354_v61  ;;  %p1357_p0 = scmp.ge.s32.totalorder %s1356_s12, %s1916_s11  ;;  %p1347_p1 = scmp.ge.s32.totalorder %s1348_s24, %s1916_s11 }
 0x211   : >> { %s2525_s12 = smov (%p1357_p0, %s1356_s12), 0  ;;  %1350 = sbr.rel (!%p1347_p1) target bundleno = 526 (0x20e), region = 160 }
 0x212   : >> { %s1546_s30 = sshll.u32 %s2525_s12, 3  ;;  %s1998_s21 = smov %s2525_s12  }
 0x213   : >> { %s1361_s20 = scalar_lea.vmem %s1342_s19, %s1546_s30 [#allocation2]   ;;  %s1362_s18 = scalar_lea.vmem %s1344_s29, %s1546_s30  }
 0x216 PF: > { %p16_p2 = scmp.ge.s32.totalorder %s2072_s13, 4   ;;  %s2517_s30 = smov %s1967_s10 }
 0x217   : > { %s2518_s10 = smov %s2080_s16  ;;  %s2519_s11 = smov %s2072_s13 }
 0x218   :  { %18 = sbr.rel (!%p16_p2) target bundleno = 2 (0x2), region = 171 }

</bundles_post_ra>
